<compile_context>
chip_gen: v7x
topology: tpu7x:2x2x1
jax: 0.10.0
libtpu: 0.0.40
codegen_flags: <defaults>
</compile_context>

<pallas_src>
import math

import jax
import jax.numpy as jnp
from jax.experimental import pallas as pl
from jax.experimental.pallas import tpu as pltpu


def _pe_add_kernel(x_ref, pe_ref, o_ref):
    # x: (Bt, C, L), pe: (1, C, L) -> broadcast add over the batch-tile axis.
    # Dropout (eval mode) is the identity.
    o_ref[...] = (x_ref[...] + pe_ref[...]).astype(o_ref.dtype)


def make_positional_encoding_table(d_model, max_len=128, dtype=jnp.float32):
    """Builds the torch `pe` buffer: shape (1, d_model, max_len)."""
    position = jnp.arange(max_len, dtype=jnp.float32)[:, None]          # (max_len, 1)
    div_term = jnp.exp(
        jnp.arange(0, d_model, 2, dtype=jnp.float32)
        * (-math.log(10000.0) / d_model))                               # (d_model//2,)
    angles = position * div_term                                        # (max_len, d_model//2)
    pe = jnp.zeros((max_len, d_model), dtype=jnp.float32)
    pe = pe.at[:, 0::2].set(jnp.sin(angles))
    pe = pe.at[:, 1::2].set(jnp.cos(angles))
    pe = jnp.transpose(pe[None, :, :], (0, 2, 1))                       # (1, d_model, max_len)
    return pe.astype(dtype)


def positional_encoding_pallas(x, pe, *, target_tile_bytes=1 << 20):
    """x: (B, C, L) with C <= d_model and L == max_len.  pe: (1, d_model, max_len)."""
    b, c, l = x.shape
    assert pe.ndim == 3 and pe.shape[0] == 1, "pe must be (1, d_model, max_len)"
    d_model, max_len = pe.shape[1], pe.shape[2]
    assert c <= d_model and l == max_len, "x must be (B, C<=d_model, L==max_len)"

    # Cast once so the in-kernel add runs natively in x's dtype (halves pe DMA
    # bytes for bf16 activations).
    pe = pe.astype(x.dtype)

    # Express the channel slice pe[:, :C] through the BlockSpec window when the
    # (8, 128) tiling constraint allows it (C % 8 == 0 or full extent); this
    # avoids materializing an extra sliced HBM buffer on every call.
    if c == d_model or c % 8 == 0:
        pe_arg = pe
    else:
        pe_arg = pe[:, :c, :]

    # TODO(synk): nn.Dropout in training mode (random mask + 1/(1-p) scaling) is
    # not implemented; inference (identity) semantics are used.

    # Pick a batch-tile so each x/out block is roughly target_tile_bytes
    # (default ~1 MiB), then shrink to the largest divisor of B so the grid
    # divides evenly.  Small blocks + double-buffering keep VMEM use far below
    # every generation's default scoped limit.
    itemsize = jnp.dtype(x.dtype).itemsize
    bytes_per_batch_row = max(1, c * l * itemsize)
    bt = max(1, min(b, target_tile_bytes // bytes_per_batch_row))
    while b % bt != 0:
        bt -= 1
    grid = (b // bt,)

    grid_spec = pltpu.PrefetchScalarGridSpec(
        num_scalar_prefetch=0,
        grid=grid,
        in_specs=[
            # x: tile over the batch axis -> pipelined load/compute/store.
            pl.BlockSpec((bt, c, l), lambda i: (i, 0, 0)),
            # pe: same block every step -> one DMA, stays resident in VMEM.
            pl.BlockSpec((1, c, l), lambda i: (0, 0, 0)),
        ],
        out_specs=pl.BlockSpec((bt, c, l), lambda i: (i, 0, 0)),
    )

    return pl.pallas_call(
        _pe_add_kernel,
        out_shape=jax.ShapeDtypeStruct((b, c, l), x.dtype),
        grid_spec=grid_spec,
        compiler_params=pltpu.CompilerParams(
            # Independent batch tiles: shardable across both TCs on v7x.
            dimension_semantics=("parallel",)),
    )(x, pe_arg)


def positional_encoding_ref(x, pe):
    """Pure-JAX reference mirroring the PyTorch forward (eval mode)."""
    return x + pe[:, :x.shape[1], :].astype(x.dtype)


if __name__ == "__main__":
    D_MODEL, MAX_LEN = 16, 128
    B, C, L = 4, 8, 128          # x: (batch, channels<=d_model, seq==max_len)

    key = jax.random.PRNGKey(0)
    x = jax.random.normal(key, (B, C, L), dtype=jnp.float32)

    pe = make_positional_encoding_table(D_MODEL, max_len=MAX_LEN)

    # Small target tile so the demo actually exercises a multi-step, pipelined
    # grid (bt=2 -> grid=(2,)); production shapes use the ~1 MiB default.
    out = positional_encoding_pallas(x, pe, target_tile_bytes=8 << 10)
    out = jax.block_until_ready(out)

    ref = positional_encoding_ref(x, pe)
    assert out.shape == (B, C, L)
    assert jnp.allclose(out, ref, atol=1e-6, rtol=1e-6), "mismatch vs reference"

    print("KERNEL_OK")
</pallas_src>

<mosaic_0001>
module attributes {stable_mosaic.version = 11 : i64} {
  func.func @_pe_add_kernel(%arg0: i32, %arg1: memref<2x8x128xf32, #tpu.memory_space<vmem>>, %arg2: memref<1x8x128xf32, #tpu.memory_space<vmem>>, %arg3: memref<2x8x128xf32, #tpu.memory_space<vmem>>) attributes {dimension_semantics = [#tpu.dimension_semantics<parallel>], iteration_bounds = array<i64: 2>, scalar_prefetch = 0 : i64, scratch_operands = 0 : i64, tpu.core_type = #tpu.core_type<tc>, window_params = [{transform_indices = @transform_0, window_bounds = array<i64: 2, 8, 128>}, {transform_indices = @transform_1, window_bounds = array<i64: 1, 8, 128>}, {transform_indices = @transform_2, window_bounds = array<i64: 2, 8, 128>}]} {
    %c0 = arith.constant 0 : index
    %c0_0 = arith.constant 0 : index
    %c0_1 = arith.constant 0 : index
    %0 = vector.load %arg1[%c0, %c0_0, %c0_1] : memref<2x8x128xf32, #tpu.memory_space<vmem>>, vector<2x8x128xf32>
    %c0_2 = arith.constant 0 : index
    %c0_3 = arith.constant 0 : index
    %c0_4 = arith.constant 0 : index
    %1 = vector.load %arg2[%c0_2, %c0_3, %c0_4] : memref<1x8x128xf32, #tpu.memory_space<vmem>>, vector<1x8x128xf32>
    %2 = vector.broadcast %1 : vector<1x8x128xf32> to vector<2x8x128xf32>
    %3 = arith.addf %0, %2 : vector<2x8x128xf32>
    %c0_5 = arith.constant 0 : index
    %c0_6 = arith.constant 0 : index
    %c0_7 = arith.constant 0 : index
    %4 = vector.load %arg3[%c0_5, %c0_6, %c0_7] : memref<2x8x128xf32, #tpu.memory_space<vmem>>, vector<2x8x128xf32>
    tpu.vector_store %arg3[%c0_5, %c0_6, %c0_7], %3 {strides = array<i32>} : memref<2x8x128xf32, #tpu.memory_space<vmem>>, vector<2x8x128xf32>,
    return
  }
  func.func @transform_0(%arg0: i32) -> (i32, i32, i32) {
    %c0_i32 = arith.constant 0 : i32
    %c0_i32_0 = arith.constant 0 : i32
    %c0_i32_1 = arith.constant 0 : i32
    return %arg0, %c0_i32, %c0_i32_0 : i32, i32, i32
  }
  func.func @transform_1(%arg0: i32) -> (i32, i32, i32) {
    %c0_i32 = arith.constant 0 : i32
    %c0_i32_0 = arith.constant 0 : i32
    %c0_i32_1 = arith.constant 0 : i32
    %c0_i32_2 = arith.constant 0 : i32
    return %c0_i32, %c0_i32_0, %c0_i32_1 : i32, i32, i32
  }
  func.func @transform_2(%arg0: i32) -> (i32, i32, i32) {
    %c0_i32 = arith.constant 0 : i32
    %c0_i32_0 = arith.constant 0 : i32
    %c0_i32_1 = arith.constant 0 : i32
    return %arg0, %c0_i32, %c0_i32_0 : i32, i32, i32
  }
}

</mosaic_0001>

<bundles_post_ra>
// kernel: tpu_custom_call.1
= control target key start
LH: loop header
LB: loop body
LE: loop exit
PB: predicated region body
PF: predicated region fallthrough
CT: control target
= control target key end

     0   :  { %7 = vsyncpa [#allocation3], 0  ;;  %s713_s0 = inlined_call_operand.hbm [shape: f32[4,8,128], index: 0, kind: input, shape index: {}]   ;;  %s714_s1 = inlined_call_operand.hbm [shape: f32[1,16,128], index: 1, kind: input, shape index: {}]   ;;  %s715_s2 = inlined_call_operand.hbm [shape: f32[4,8,128], index: 2, kind: output, shape index: {}]  }
   0x1   :  { %9 = vsyncpa [#allocation3 + $0x1], 0 }
   0x2   :  { %10 = vsyncpa [#allocation6], 0 }
   0x3   :  { %11 = vsyncpa [#allocation4], 0 }
   0x4   :  { %13 = vsyncpa [#allocation4 + $0x1], 0  ;;  %s512_s9 = smov 0   ;;  %s514_s10 = smov 0  }
   0x5   :  { %s516_s11 = smov 0   ;;  %s518_s12 = smov 0  }
   0x6 LB: > { %s533_s13 = sadd.s32 4294967295, %s488_s12   ;;  %s281_s14 = sadd.s32 4294967294, %s488_s12   ;;  %s488_s12 = sphi %s518_s12, %s740_s12   ;;  %s484_s11 = sphi %s516_s11, %s739_s11   ;;  %s480_s10 = sphi %s514_s10, %s738_s10   ;;  %s476_s9 = sphi %s512_s9, %s737_s9  }
   0x7   : > { %s537_s15 = sadd.s32 1, %s488_s12   ;;  %s26_s16 = sadd.s32 1, %s484_s11 }
   0x8   : > { %s23_s17 = ssub.s32 %s488_s12, %s537_s15  ;;  %p33_p0 = scmp.ne.s32.totalorder %s484_s11, %s480_s10 }
   0x9   : > { %p24_p1 = scmp.eq.s32.totalorder %s23_s17, 0  ;;  %p34_p2 = scmp.eq.s32.totalorder %s488_s12, 0 }
   0xa   : > { %p39_p3 = scmp.ne.s32.totalorder %s480_s10, %s476_s9  ;;  %p716_p4 = scmp.eq.s32.totalorder %s533_s13, 0 }
   0xb   : > { %s549_s18 = scalar_select %p24_p1, %s484_s11, %s26_s16  }
   0xc   : > { %p551_p5 = por %p34_p2, %p33_p0  ;;  %p557_p6 = por %p716_p4, %p39_p3 }
   0xd   : > { %p84_p7 = scmp.eq.s32.totalorder %s533_s13, 1  ;;  %p90_p8 = scmp.eq.s32.totalorder %s281_s14, 1 }
   0xe   : > { %s722_s20 = scalar_select %p557_p6, 1, 0 }
   0xf   : > { %p282_p9 = scmp.ge.s32.totalorder %s488_s12, 1  ;;  %p97_p10 = scmp.lt.s32.totalorder %s488_s12, 3 }
  0x10   : > { %p564_p11 = por %p84_p7, %p33_p0  ;;  %p568_p12 = por %p90_p8, %p39_p3 }
  0x11   : > { %p572_p13 = pnand %p282_p9, %p97_p10  ;;  %s490_s24 = smov [#allocation5]  }
  0x12   : > { %s723_s21 = scalar_select %p564_p11, 1, 0 }
  0x13   : > { %s724_s22 = scalar_select %p568_p12, 1, 0 }
  0x14   : > { %s725_s23 = scalar_select %p572_p13, 1, 0 }
  0x15   : > { %p307_p2 = pneg %p572_p13  ;;  %s110_s25 = sshll.u32 %s490_s24, 4  ;;  %s111_s25 = int_to_ptr.vmem [resolvable:$true] %s110_s25 }
  0x16   : > { %p320_p4 = scmp.lt.s32.totalorder %s488_s12, 2  ;;  %p726_p0 = scmp.eq.s32.totalorder %s533_s13, 0 }
  0x17   : > { %s121_s27 = sand.u32 1, %s484_s11   ;;  %s360_s4 = scalar_lea.hbm %s714_s1, 128 }
  0x18   : > { %p582_p7 = pnand %p307_p2, %p726_p0  ;;  %p589_p3 = pnand %p320_p4, %p551_p5 }
  0x19   : > { %s285_s29 = sshll.u32 %s121_s27, 4  ;;  %p361_p8 = scmp.ne.s32.totalorder %s714_s1, %s360_s4 }
  0x1a   : > { %s728_s28 = scalar_select %p589_p3, 1, 0 }
  0x1b   : > { %p362_p9 = pneg %p582_p7  ;;  %s365_s14 = scalar_lea.hbm %s714_s1, 256 }
  0x1c   : > { %p366_p4 = scmp.lt.u32.totalorder %s365_s14, %s360_s4  ;;  %p367_p5 = scmp.lt.u32.totalorder %s360_s4, %s714_s1 }
  0x1d   : > { %p363_p10 = pnand %p362_p9, %p361_p8 }
  0x1e   : > { %p368_p0 = por %p367_p5, %p366_p4 }
  0x1f   : > { %p364_p2 = pneg %p363_p10 }
  0x21   : > { %p369_p1 = pnand %p368_p0, %p364_p2 }
  0x23   : > { %372 = shalt.err (!%p369_p1)
}
  0x24   : > { %s373_s19 = scalar_lea.vmem %s111_s25, 128  ;;  %p381_p13 = scmp.lt.s32.totalorder %s111_s25, %s111_s25 }
  0x25   : > { %p374_p12 = scmp.ne.s32.totalorder %s111_s25, %s373_s19  ;;  %p382_p3 = scmp.lt.s32.totalorder %s373_s19, %s373_s19 }
  0x27   : > { %p376_p11 = pnand %p374_p12, %p362_p9  ;;  %p383_p8 = por %p382_p3, %p381_p13 }
  0x29   : > { %p377_p6 = pneg %p376_p11 }
  0x2b   : > { %p384_p10 = pnand %p383_p8, %p377_p6 }
  0x2d   : > { %387 = shalt.err (!%p384_p10)
}
  0x2e   : > { %310 = dma.hbm_to_vmem [thread:$0]  (!%p582_p7), %s714_s1, 128, %s111_s25, [#allocation6]  }
  0x2f   : > { %s297_s3 = sshll.u32 %s488_s12, 8  ;;  %s125_s4 = scalar_lea.vmem [#allocation2], %s285_s29 }
  0x30   : > { %s132_s5 = sshll.u32 %s125_s4, 4  ;;  %s616_s8 = scalar_lea.hbm %s713_s0, %s297_s3  ;;  %s618_s5 = int_to_ptr.vmem [resolvable:$true] %s132_s5 }
  0x31   : > { %s620_s26 = scalar_lea.sflag [#allocation3], %s121_s27  ;;  %s388_s14 = scalar_lea.hbm %s616_s8, 256 }
  0x32   : > { %p389_p6 = scmp.ne.s32.totalorder %s616_s8, %s388_s14  ;;  %p729_p11 = scmp.ne.s32.totalorder %s728_s28, 0 }
  0x33   : > { %s393_s16 = scalar_lea.hbm %s713_s0, 512  ;;  %p394_p7 = scmp.lt.u32.totalorder %s616_s8, %s713_s0 }
  0x34   : > { %p390_p12 = pneg %p729_p11  ;;  %p395_p3 = scmp.lt.u32.totalorder %s393_s16, %s388_s14 }
  0x35   : > { %p397_p2 = scmp.lt.u32.totalorder %s388_s14, %s616_s8 }
  0x36   : > { %p391_p13 = pnand %p390_p12, %p389_p6  ;;  %p396_p9 = por %p395_p3, %p394_p7 }
  0x38   : > { %p392_p1 = pneg %p391_p13  ;;  %p398_p4 = por %p397_p2, %p396_p9 }
  0x3a   : > { %p399_p5 = pnand %p398_p4, %p392_p1 }
  0x3c   : > { %402 = shalt.err (!%p399_p5)
}
  0x3d   : > { %s403_s27 = scalar_lea.vmem %s618_s5, 256  ;;  %s491_s24 = smov [#allocation2]  }
  0x3e   : > { %p404_p0 = scmp.ne.s32.totalorder %s618_s5, %s403_s27  ;;  %s408_s30 = sshll.u32 %s491_s24, 4  ;;  %s409_s30 = int_to_ptr.vmem [resolvable:$false] %s408_s30 }
  0x3f   : > { %s410_s3 = scalar_lea.vmem %s409_s30, 512  ;;  %p411_p6 = scmp.lt.s32.totalorder %s618_s5, %s409_s30 }
  0x40   : > { %p406_p8 = pnand %p404_p0, %p390_p12  ;;  %p412_p13 = scmp.lt.s32.totalorder %s410_s3, %s403_s27 }
  0x42   : > { %p407_p10 = pneg %p406_p8  ;;  %p413_p7 = por %p412_p13, %p411_p6 }
  0x44   : > { %p414_p3 = pnand %p413_p7, %p407_p10 }
  0x46   : > { %417 = shalt.err (!%p414_p3)
}
  0x47   : > { %s492_s4 = smov 128   ;;  %s493_s6 = smov 8  }
  0x48   : > { %314 = dma.hbm_to_vmem [thread:$0]  (!%p729_p11), %s616_s8, 256, %s618_s5, %s620_s26, %s492_s4, %s492_s4, %s493_s6  }
  0x49   : > { %p730_p12 = scmp.ne.s32.totalorder %s725_s23, 0 }
  0x4a   : > { %s651_s7 = sand.u32 (!%p730_p12), 1, %s480_s10   ;;  %p731_p1 = scmp.ne.s32.totalorder (!%p730_p12), %s722_s20, 0 }
  0x4b   : > { %144 = sbr.rel (%p730_p12) target bundleno = 113 (0x71), region = 28  ;;  %s289_s14 = sshll.u32 (!%p730_p12), %s651_s7, 4 }
  0x4c   : > { %s147_s25 = scalar_lea.sflag (!%p730_p12), [#allocation3], %s651_s7  ;;  %s150_s29 = scalar_lea.vmem (!%p730_p12), [#allocation2], %s289_s14 }
  0x52   : > { %463 = dma.done.wait (%p731_p1), %s147_s25, 256  }
  0x53   : > { %465 = vsyncadd (%p731_p1), %s147_s25, 4294967040  ;;  %p732_p9 = scmp.eq.s32.totalorder %s533_s13, 0 }
  0x55   : > { %467 = dma.done.wait (%p732_p9), [#allocation6], 128   ;;  %p733_p11 = pmov %p732_p9 }
  0x56   : > { %s174_s23 = scalar_lea.vmem [#allocation7], %s289_s14  ;;  %s298_s5 = sshll.u32 %s533_s13, 8  ;;  %v177_v0 = vld [vmem:[%s150_s29] sm:$0xff]  ;;  %v178_v2 = vld [vmem:[%s150_s29 + $0x8] sm:$0xff] }
  0x57   : > { %469 = vsyncadd (%p733_p11), [#allocation6], 4294967168  ;;  %s198_s28 = sshll.u32 %s174_s23, 4  ;;  %v179_v1 = vld [vmem:[#allocation5] sm:$0xff]  ;;  %s669_s26 = scalar_lea.hbm %s715_s2, %s298_s5  ;;  %s664_s28 = int_to_ptr.vmem [resolvable:$true] %s198_s28 }
  0x58   : > { %v180_v3 = vadd.f32 %v179_v1, %v177_v0  ;;  %v181_v4 = vadd.f32 %v179_v1, %v178_v2  ;;  %s185_s16 = scalar_lea.sflag [#allocation4], %s651_s7  ;;  %s418_s17 = scalar_lea.vmem %s664_s28, 256 }
  0x59   : > { %p419_p2 = scmp.ne.s32.totalorder %s664_s28, %s418_s17  ;;  %p734_p4 = scmp.ne.s32.totalorder %s723_s21, 0 }
  0x5a   : > { %182 = vst [vmem:[%s174_s23] sm:$0xff] %v180_v3  ;;  %183 = vst [vmem:[%s174_s23 + $0x8] sm:$0xff] %v181_v4  ;;  %s494_s13 = smov [#allocation7]  }
  0x5b   : > { %p420_p5 = pnand %p419_p2, %p734_p4  ;;  %s422_s19 = sshll.u32 %s494_s13, 4  ;;  %s423_s19 = int_to_ptr.vmem [resolvable:$false] %s422_s19 }
  0x5c   : > { %s424_s27 = scalar_lea.vmem %s423_s19, 512  ;;  %p425_p8 = scmp.lt.s32.totalorder %s664_s28, %s423_s19 }
  0x5d   : > { %p421_p0 = pneg %p420_p5  ;;  %p426_p10 = scmp.lt.s32.totalorder %s424_s27, %s418_s17 }
  0x5f   : > { %p427_p6 = por %p426_p10, %p425_p8 }
  0x61   : > { %p428_p13 = pnand %p427_p6, %p421_p0 }
  0x63   : > { %431 = shalt.err (!%p428_p13)
}
  0x64   : > { %s432_s24 = scalar_lea.hbm %s669_s26, 256  ;;  %s436_s4 = scalar_lea.hbm %s715_s2, 512 }
  0x65   : > { %p433_p7 = scmp.ne.s32.totalorder %s669_s26, %s432_s24  ;;  %p437_p1 = scmp.lt.u32.totalorder %s669_s26, %s715_s2 }
  0x66   : > { %p438_p9 = scmp.lt.u32.totalorder %s436_s4, %s432_s24  ;;  %p440_p2 = scmp.lt.u32.totalorder %s432_s24, %s669_s26 }
  0x67   : > { %p434_p3 = pnand %p433_p7, %p734_p4 }
  0x68   : > { %p439_p11 = por %p438_p9, %p437_p1 }
  0x69   : > { %p435_p12 = pneg %p434_p3 }
  0x6a   : > { %p441_p5 = por %p440_p2, %p439_p11 }
  0x6c   : > { %p442_p0 = pnand %p441_p5, %p435_p12 }
  0x6e   : > { %445 = shalt.err (!%p442_p0)
}
  0x6f   : > { %s495_s25 = smov 128   ;;  %s496_s29 = smov 8  }
  0x70   : > { %305 = dma.vmem_to_hbm [thread:$0]  (%p734_p4), %s664_s28, 256, %s669_s26, %s185_s16, %s495_s25, %s495_s25, %s496_s29  }
  0x71 PF: > { %s213_s23 = sand.u32 1, %s476_s9   ;;  %p735_p8 = scmp.ne.s32.totalorder %s724_s22, 0 }
  0x72   : > { %p736_p10 = scmp.ge.s32.totalorder %s488_s12, 2  ;;  %s214_s5 = scalar_lea.sflag [#allocation4], %s213_s23 }
  0x74   : > { %p316_p6 = pnand %p736_p10, %p735_p8 }
  0x76   : > { %471 = dma.done.wait (!%p316_p6), %s214_s5, 256  }
  0x77   : > { %473 = vsyncadd (!%p316_p6), %s214_s5, 4294967040  ;;  %p16_p13 = scmp.ge.s32.totalorder %s537_s15, 4   ;;  %s737_s9 = smov %s480_s10 }
  0x78   : > { %s738_s10 = smov %s484_s11  ;;  %s739_s11 = smov %s549_s18 }
  0x79   : > { %s740_s12 = smov %s537_s15  ;;  %18 = sbr.rel (!%p16_p13) target bundleno = 6 (0x6), region = 77 }
  0x80   :  { %219 = vsyncpa [#allocation3], 1 }
  0x81   :  { %221 = vsyncpa [#allocation3 + $0x1], 1 }
  0x82   :  { %222 = vsyncpa [#allocation6], 1 }
  0x83   :  { %223 = vsyncpa [#allocation4], 1 }
  0x84   :  { %225 = vsyncpa [#allocation4 + $0x1], 1 }

</bundles_post_ra>
